<compile_context>
chip_gen: v6e
topology: v6e:2x2x1
jax: 0.10.0
libtpu: 0.0.40
codegen_flags: <defaults>
</compile_context>

<pallas_src>
import functools
import math

import numpy as np
import jax
import jax.numpy as jnp
from jax.experimental import pallas as pl
from jax.experimental.pallas import tpu as pltpu

# ---------------- synthetic model config ----------------
EMBED_DIM = 32
NUM_HEADS = 4           # attribute only (mirrors model.num_heads)
TUBELET = 2
PATCH = 4
NUM_LAYERS = 2
OUT_LAYERS = (0, 1)     # "multilevel": return every layer's tokens
MAX_FRAMES = 32         # max_T = 16 rows in the pos table (> num_clips*F used below)

assert 128 % EMBED_DIM == 0
PACK = 128 // EMBED_DIM             # tokens packed per lane-dense row (=4)
STREAM_DTYPE = jnp.bfloat16         # HBM-streaming dtype (MXU-native); accum stays f32


def _round_up(x, m):
    return (x + m - 1) // m * m


# ---------------- sincos positional table ----------------
def get_1d_sincos_pos_embed(embed_dim, length):
    pos = np.arange(length, dtype=np.float64)
    omega = np.arange(embed_dim // 2, dtype=np.float64) / (embed_dim / 2.0)
    omega = 1.0 / (10000.0 ** omega)
    out = np.einsum("m,d->md", pos, omega)
    return np.concatenate([np.sin(out), np.cos(out)], axis=1).astype(np.float32)


# ---------------- fused encoder kernel ----------------
def _encoder_kernel(*refs, num_layers, out_idx):
    # refs = (x, w_embed_bd, b_embed_t, w_bd[0..L-1], b_t[0..L-1], o[0..n_out-1])
    x_ref = refs[0]
    we_ref, be_ref = refs[1], refs[2]
    w_refs = refs[3:3 + num_layers]
    b_refs = refs[3 + num_layers:3 + 2 * num_layers]
    o_refs = refs[3 + 2 * num_layers:]

    # patch embed: (tm, PACK*Kin) bf16 @ (PACK*Kin, PACK*D) bf16 -> f32
    h = jnp.dot(x_ref[...], we_ref[...], preferred_element_type=jnp.float32)
    h = h + be_ref[...]

    k = 0
    for l in range(num_layers):
        z = jnp.dot(h.astype(w_refs[l].dtype), w_refs[l][...],
                    preferred_element_type=jnp.float32)
        z = z + b_refs[l][...]
        h = jax.nn.gelu(z) + h            # GELU / bias / residual in f32 (safe on v5e VPU)
        if l in out_idx:
            o_refs[k][...] = h.astype(o_refs[k].dtype)   # bf16 writeback
            k += 1


def pallas_encoder(patches, params, *, tm_max=1024):
    """patches: (M, Kin) token rows -> list of (M, EMBED_DIM) bf16, one per OUT_LAYER."""
    M, Kin = patches.shape
    D = EMBED_DIM
    num_layers = len(params["w"])
    out_idx = tuple(OUT_LAYERS)
    n_out = len(out_idx)

    # ---- pack PACK tokens per row so every minor dim is a multiple of 128 ----
    m4 = _round_up(M, PACK)
    mp0 = _round_up(m4 // PACK, 8)          # packed rows, sublane aligned
    if mp0 >= 16:
        # at least 2 grid steps so the parallel axis shards across v7x's two TCs
        tm = min(tm_max, _round_up(-(-mp0 // 2), 8))
    else:
        tm = mp0
    mp = _round_up(mp0, tm)
    tok_pad = mp * PACK

    xs = patches.astype(STREAM_DTYPE)       # no-op if already bf16
    if tok_pad != M:
        xs = jnp.pad(xs, ((0, tok_pad - M), (0, 0)))
    xp = xs.reshape(mp, PACK * Kin)         # free row-major reshape

    # ---- block-diagonal packed weights (tiny; VMEM-resident via constant index_maps) ----
    eye = jnp.eye(PACK, dtype=jnp.float32)
    we_bd = jnp.kron(eye, params["w_embed"]).astype(STREAM_DTYPE)       # (PACK*Kin, PACK*D)
    be_t = jnp.tile(params["b_embed"], (1, PACK))                        # (1, PACK*D) f32
    w_bd = [jnp.kron(eye, w).astype(STREAM_DTYPE) for w in params["w"]]  # (PACK*D, PACK*D)
    b_t = [jnp.tile(b, (1, PACK)) for b in params["b"]]                  # (1, PACK*D) f32

    row = lambda i: (i, 0)
    const = lambda i: (0, 0)
    in_specs = [pl.BlockSpec((tm, PACK * Kin), row),
                pl.BlockSpec((PACK * Kin, PACK * D), const),
                pl.BlockSpec((1, PACK * D), const)]
    in_specs += [pl.BlockSpec((PACK * D, PACK * D), const) for _ in range(num_layers)]
    in_specs += [pl.BlockSpec((1, PACK * D), const) for _ in range(num_layers)]
    out_specs = [pl.BlockSpec((tm, PACK * D), row) for _ in range(n_out)]
    out_shape = tuple(jax.ShapeDtypeStruct((mp, PACK * D), STREAM_DTYPE)
                      for _ in range(n_out))

    kern = functools.partial(_encoder_kernel, num_layers=num_layers, out_idx=out_idx)
    outs = pl.pallas_call(
        kern,
        out_shape=out_shape,
        grid_spec=pltpu.PrefetchScalarGridSpec(
            num_scalar_prefetch=0,
            grid=(mp // tm,),
            in_specs=in_specs,
            out_specs=out_specs,
        ),
        compiler_params=pltpu.CompilerParams(dimension_semantics=("parallel",)),
    )(xp, we_bd, be_t, *w_bd, *b_t)

    # unpack: (mp, PACK*D) -> (tok_pad, D) -> slice padded token rows away
    return [o.reshape(tok_pad, D)[:M] for o in outs]


# ---------------- pos-embed broadcast-add kernel ----------------
def _pos_add_kernel(x_ref, pe_ref, o_ref, *, reps):
    pe = pe_ref[...]                                   # (tr, wfac*D) f32, lane-dense
    if reps > 1:
        pe = jnp.concatenate([pe] * reps, axis=-1)     # (tr, S*D) full-vreg concats
    o_ref[...] = x_ref[...].astype(jnp.float32) + pe


def pallas_pos_add(x, pe, s):
    """x: (B, NCT*s, D) bf16; pe: (B, NCT, D) f32. Adds pe broadcast over s without
    materializing the s-times-repeated table in HBM. Returns f32."""
    B, N, D = x.shape
    nct = N // s
    rows = B * nct
    x2 = x.reshape(rows, s * D)                 # free row-major reshape (lane-dense rows)
    wfac = math.gcd(s, PACK)                    # pre-widen the tiny table to 128 lanes
    p2 = pe.reshape(rows, D).astype(jnp.float32)
    if wfac > 1:
        p2 = jnp.tile(p2, (1, wfac))            # (rows, wfac*D) -- still tiny

    r8 = _round_up(rows, 8)
    if r8 >= 16:
        tr = min(2048, _round_up(-(-r8 // 2), 8))   # >=2 grid steps for v7x
    else:
        tr = r8
    rows_pad = _round_up(r8, tr)
    if rows_pad != rows:
        x2 = jnp.pad(x2, ((0, rows_pad - rows), (0, 0)))
        p2 = jnp.pad(p2, ((0, rows_pad - rows), (0, 0)))

    kern = functools.partial(_pos_add_kernel, reps=s // wfac)
    out = pl.pallas_call(
        kern,
        out_shape=jax.ShapeDtypeStruct((rows_pad, s * D), jnp.float32),
        grid_spec=pltpu.PrefetchScalarGridSpec(
            num_scalar_prefetch=0,
            grid=(rows_pad // tr,),
            in_specs=[pl.BlockSpec((tr, s * D), lambda i: (i, 0)),
                      pl.BlockSpec((tr, wfac * D), lambda i: (i, 0))],
            out_specs=pl.BlockSpec((tr, s * D), lambda i: (i, 0)),
        ),
        compiler_params=pltpu.CompilerParams(dimension_semantics=("parallel",)),
    )(x2, p2)
    return out[:rows].reshape(B, N, D)


# ---------------- pure-JAX references (numerics-matched: bf16 streaming, f32 accum) ----------------
def ref_encoder(patches, params):
    h = jnp.dot(patches.astype(STREAM_DTYPE), params["w_embed"].astype(STREAM_DTYPE),
                preferred_element_type=jnp.float32) + params["b_embed"]
    outs = []
    for l in range(len(params["w"])):
        z = jnp.dot(h.astype(STREAM_DTYPE), params["w"][l].astype(STREAM_DTYPE),
                    preferred_element_type=jnp.float32) + params["b"][l]
        h = jax.nn.gelu(z) + h
        if l in OUT_LAYERS:
            outs.append(h.astype(STREAM_DTYPE))      # match bf16 writeback
    return outs


def ref_pos_add(x, pe, s):
    B, N, D = x.shape
    pe_rep = jnp.repeat(pe[:, :, None, :], s, axis=2).reshape(B, N, D)
    return x.astype(jnp.float32) + pe_rep


# ---------------- synthetic frozen encoder ("self.model") ----------------
def init_params(key, in_channels):
    kin = in_channels * TUBELET * PATCH * PATCH
    keys = jax.random.split(key, 1 + NUM_LAYERS)
    return {
        "w_embed": 0.02 * jax.random.normal(keys[0], (kin, EMBED_DIM), jnp.float32),
        "b_embed": jnp.zeros((1, EMBED_DIM), jnp.float32),
        "w": [
            0.02 * jax.random.normal(keys[1 + l], (EMBED_DIM, EMBED_DIM), jnp.float32)
            for l in range(NUM_LAYERS)
        ],
        "b": [
            jnp.full((1, EMBED_DIM), 0.01 * (l + 1), jnp.float32)
            for l in range(NUM_LAYERS)
        ],
    }


def model_forward(x7, params, encoder):
    """x7: (NC, NV, B, C, F, H, W) stacked video.
    Returns list of (NV*B*NC, T*S_sp, D), big-batch in view-major/batch/clip order."""
    NC, NV, B_, C, F, H, W = x7.shape
    T, Hp, Wp = F // TUBELET, H // PATCH, W // PATCH
    # bf16 BEFORE the shuffle: the patchify copy moves half the bytes
    xb = x7.astype(STREAM_DTYPE)
    # tubelet patchification (Conv3d patch-embed expressed as a matmul); the view-major
    # big-batch reorder is folded into this single XLA transpose.
    p = xb.reshape(NC, NV, B_, C, T, TUBELET, Hp, PATCH, Wp, PATCH)
    p = p.transpose(1, 2, 0, 4, 6, 8, 3, 5, 7, 9)   # (NV,B,NC,T,Hp,Wp,C,ts,ph,pw)
    patches = p.reshape(NV * B_ * NC * T * Hp * Wp, C * TUBELET * PATCH * PATCH)
    feats = encoder(patches, params)                 # list of (tokens, D)
    return [f.reshape(NV * B_ * NC, T * Hp * Wp, EMBED_DIM) for f in feats]


# ---------------- ClipAggregation.forward ----------------
def clip_aggregation_forward(x, clip_indices, params, pos_embed, *, encoder, add_fn):
    num_clips = len(x)
    num_views_per_clip = len(x[0])
    B, C, F, H, W = x[0][0].shape

    # stack clips/views; big-batch order becomes view-major/batch/clip inside
    # model_forward so the per-view regroup below is a zero-copy slice+reshape.
    x7 = jnp.stack([jnp.stack(xi, axis=0) for xi in x], axis=0)   # (NC, NV, B, C, F, H, W)
    outputs = model_forward(x7, params, encoder)                  # list of (NV*B*NC, T*S_sp, D)
    outputs = jnp.concatenate(outputs, axis=1)                    # multilevel concat along tokens

    bigB, N, D = outputs.shape
    T = F // TUBELET
    S = N // T                                                    # = n_out_layers * S_spatial

    results = []
    for j in range(num_views_per_clip):
        # view j slab, leading dim ordered (b, clip): pure reshape to (B, NC*T*S, D)
        o = outputs[j * B * num_clips:(j + 1) * B * num_clips]    # (B*NC, N, D)
        outs = o.reshape(B, num_clips * T * S, D)
        if pos_embed is not None and clip_indices is not None:
            # NOTE: as in the PyTorch module, the strided clip_indices index the
            # max_T-row table directly; the caller must keep them in range
            # (torch.gather would hard-error, jnp.take would clamp silently).
            _indices = [c[:, ::TUBELET] for c in clip_indices]                   # (B, T) each
            pe = jnp.concatenate(
                [jnp.take(pos_embed, idx, axis=0) for idx in _indices], axis=1)  # (B, NC*T, D)
            outs = add_fn(outs, pe, S)   # broadcast over S happens inside the kernel
        results.append(outs)
    return results


if __name__ == "__main__":
    key = jax.random.PRNGKey(0)
    B, C, F, H, W = 2, 4, 4, 8, 8
    num_clips, num_views = 2, 2

    keys = jax.random.split(key, num_clips * num_views + 1)
    x_list = [
        [
            jax.random.normal(keys[i * num_views + j], (B, C, F, H, W), jnp.float32)
            for j in range(num_views)
        ]
        for i in range(num_clips)
    ]
    params = init_params(keys[-1], C)
    max_T = MAX_FRAMES // TUBELET
    pos_tab = jnp.asarray(get_1d_sincos_pos_embed(EMBED_DIM, max_T))
    clip_indices = [
        jnp.tile(jnp.arange(i * F, (i + 1) * F, dtype=jnp.int32)[None, :], (B, 1))
        for i in range(num_clips)
    ]
    # guard the original module's indexing contract (see NOTE above)
    assert max(int(jnp.max(c[:, ::TUBELET])) for c in clip_indices) < max_T

    fwd = functools.partial(clip_aggregation_forward, params=params, pos_embed=pos_tab)

    outs = fwd(x_list, clip_indices, encoder=pallas_encoder, add_fn=pallas_pos_add)
    outs = [jax.block_until_ready(o) for o in outs]

    # numerics-matched pure-JAX reference (same bf16 streaming / f32 accumulation /
    # bf16 encoder writeback).  Tolerance allows one bf16 ulp of disagreement where the
    # kernel's packed-K MXU accumulation order and the reference's plain matmul land on
    # opposite sides of a bf16 rounding boundary.
    refs = fwd(x_list, clip_indices, encoder=ref_encoder, add_fn=ref_pos_add)

    T = F // TUBELET
    S = len(OUT_LAYERS) * (H // PATCH) * (W // PATCH)
    for o, r in zip(outs, refs):
        assert o.shape == (B, num_clips * T * S, EMBED_DIM), o.shape
        np.testing.assert_allclose(np.asarray(o), np.asarray(r), rtol=5e-3, atol=1e-2)

    print("KERNEL_OK")
</pallas_src>

<mosaic_0001>
module attributes {stable_mosaic.version = 11 : i64} {
  func.func @_encoder_kernel(%arg0: i32, %arg1: memref<8x512xbf16, #tpu.memory_space<vmem>>, %arg2: memref<512x128xbf16, #tpu.memory_space<vmem>>, %arg3: memref<1x128xf32, #tpu.memory_space<vmem>>, %arg4: memref<128x128xbf16, #tpu.memory_space<vmem>>, %arg5: memref<128x128xbf16, #tpu.memory_space<vmem>>, %arg6: memref<1x128xf32, #tpu.memory_space<vmem>>, %arg7: memref<1x128xf32, #tpu.memory_space<vmem>>, %arg8: memref<8x128xbf16, #tpu.memory_space<vmem>>, %arg9: memref<8x128xbf16, #tpu.memory_space<vmem>>) attributes {dimension_semantics = [#tpu.dimension_semantics<parallel>], iteration_bounds = array<i64: 2>, scalar_prefetch = 0 : i64, scratch_operands = 0 : i64, tpu.core_type = #tpu.core_type<tc>, window_params = [{transform_indices = @transform_0, window_bounds = array<i64: 8, 512>}, {pipeline_mode = #tpu.pipeline_mode<synchronous>, transform_indices = @transform_1, window_bounds = array<i64: 512, 128>}, {pipeline_mode = #tpu.pipeline_mode<synchronous>, transform_indices = @transform_2, window_bounds = array<i64: 1, 128>}, {pipeline_mode = #tpu.pipeline_mode<synchronous>, transform_indices = @transform_3, window_bounds = array<i64: 128, 128>}, {pipeline_mode = #tpu.pipeline_mode<synchronous>, transform_indices = @transform_4, window_bounds = array<i64: 128, 128>}, {pipeline_mode = #tpu.pipeline_mode<synchronous>, transform_indices = @transform_5, window_bounds = array<i64: 1, 128>}, {pipeline_mode = #tpu.pipeline_mode<synchronous>, transform_indices = @transform_6, window_bounds = array<i64: 1, 128>}, {transform_indices = @transform_7, window_bounds = array<i64: 8, 128>}, {transform_indices = @transform_8, window_bounds = array<i64: 8, 128>}]} {
    %c0 = arith.constant 0 : index
    %c0_0 = arith.constant 0 : index
    %0 = vector.load %arg1[%c0, %c0_0] : memref<8x512xbf16, #tpu.memory_space<vmem>>, vector<8x512xbf16>
    %c0_1 = arith.constant 0 : index
    %c0_2 = arith.constant 0 : index
    %1 = vector.load %arg2[%c0_1, %c0_2] : memref<512x128xbf16, #tpu.memory_space<vmem>>, vector<512x128xbf16>
    %cst = arith.constant dense<0.000000e+00> : vector<8x128xf32>
    %2 = tpu.matmul %0, %1, %cst {dimension_numbers = #tpu.dot_dimension_numbers<[1], [0], [0], [1], [0, 0, 1, 1], [], []>} : vector<8x512xbf16>, vector<512x128xbf16>, vector<8x128xf32> -> vector<8x128xf32>
    %c0_3 = arith.constant 0 : index
    %c0_4 = arith.constant 0 : index
    %3 = vector.load %arg3[%c0_3, %c0_4] : memref<1x128xf32, #tpu.memory_space<vmem>>, vector<1x128xf32>
    %4 = vector.broadcast %3 : vector<1x128xf32> to vector<8x128xf32>
    %5 = arith.addf %2, %4 : vector<8x128xf32>
    %6 = arith.truncf %5 : vector<8x128xf32> to vector<8x128xbf16>
    %c0_5 = arith.constant 0 : index
    %c0_6 = arith.constant 0 : index
    %7 = vector.load %arg4[%c0_5, %c0_6] : memref<128x128xbf16, #tpu.memory_space<vmem>>, vector<128x128xbf16>
    %cst_7 = arith.constant dense<0.000000e+00> : vector<8x128xf32>
    %8 = tpu.matmul %6, %7, %cst_7 {dimension_numbers = #tpu.dot_dimension_numbers<[1], [0], [0], [1], [0, 0, 1, 1], [], []>} : vector<8x128xbf16>, vector<128x128xbf16>, vector<8x128xf32> -> vector<8x128xf32>
    %c0_8 = arith.constant 0 : index
    %c0_9 = arith.constant 0 : index
    %9 = vector.load %arg6[%c0_8, %c0_9] : memref<1x128xf32, #tpu.memory_space<vmem>>, vector<1x128xf32>
    %10 = vector.broadcast %9 : vector<1x128xf32> to vector<8x128xf32>
    %11 = arith.addf %8, %10 : vector<8x128xf32>
    %12 = arith.mulf %11, %11 : vector<8x128xf32>
    %13 = arith.mulf %11, %12 : vector<8x128xf32>
    %cst_10 = arith.constant 4.471500e-02 : f32
    %14 = vector.broadcast %cst_10 : f32 to vector<8x128xf32>
    %15 = arith.mulf %14, %13 : vector<8x128xf32>
    %16 = arith.addf %11, %15 : vector<8x128xf32>
    %cst_11 = arith.constant 0.797884583 : f32
    %17 = vector.broadcast %cst_11 : f32 to vector<8x128xf32>
    %18 = arith.mulf %17, %16 : vector<8x128xf32>
    %19 = math.tanh %18 : vector<8x128xf32>
    %cst_12 = arith.constant 1.000000e+00 : f32
    %20 = vector.broadcast %cst_12 : f32 to vector<8x128xf32>
    %21 = arith.addf %20, %19 : vector<8x128xf32>
    %cst_13 = arith.constant 5.000000e-01 : f32
    %22 = vector.broadcast %cst_13 : f32 to vector<8x128xf32>
    %23 = arith.mulf %22, %21 : vector<8x128xf32>
    %24 = arith.mulf %11, %23 : vector<8x128xf32>
    %25 = arith.addf %24, %5 : vector<8x128xf32>
    %26 = arith.truncf %25 : vector<8x128xf32> to vector<8x128xbf16>
    %c0_14 = arith.constant 0 : index
    %c0_15 = arith.constant 0 : index
    %27 = vector.load %arg8[%c0_14, %c0_15] : memref<8x128xbf16, #tpu.memory_space<vmem>>, vector<8x128xbf16>
    tpu.vector_store %arg8[%c0_14, %c0_15], %26 {strides = array<i32>} : memref<8x128xbf16, #tpu.memory_space<vmem>>, vector<8x128xbf16>,
    %28 = arith.truncf %25 : vector<8x128xf32> to vector<8x128xbf16>
    %c0_16 = arith.constant 0 : index
    %c0_17 = arith.constant 0 : index
    %29 = vector.load %arg5[%c0_16, %c0_17] : memref<128x128xbf16, #tpu.memory_space<vmem>>, vector<128x128xbf16>
    %cst_18 = arith.constant dense<0.000000e+00> : vector<8x128xf32>
    %30 = tpu.matmul %28, %29, %cst_18 {dimension_numbers = #tpu.dot_dimension_numbers<[1], [0], [0], [1], [0, 0, 1, 1], [], []>} : vector<8x128xbf16>, vector<128x128xbf16>, vector<8x128xf32> -> vector<8x128xf32>
    %c0_19 = arith.constant 0 : index
    %c0_20 = arith.constant 0 : index
    %31 = vector.load %arg7[%c0_19, %c0_20] : memref<1x128xf32, #tpu.memory_space<vmem>>, vector<1x128xf32>
    %32 = vector.broadcast %31 : vector<1x128xf32> to vector<8x128xf32>
    %33 = arith.addf %30, %32 : vector<8x128xf32>
    %34 = arith.mulf %33, %33 : vector<8x128xf32>
    %35 = arith.mulf %33, %34 : vector<8x128xf32>
    %cst_21 = arith.constant 4.471500e-02 : f32
    %36 = vector.broadcast %cst_21 : f32 to vector<8x128xf32>
    %37 = arith.mulf %36, %35 : vector<8x128xf32>
    %38 = arith.addf %33, %37 : vector<8x128xf32>
    %cst_22 = arith.constant 0.797884583 : f32
    %39 = vector.broadcast %cst_22 : f32 to vector<8x128xf32>
    %40 = arith.mulf %39, %38 : vector<8x128xf32>
    %41 = math.tanh %40 : vector<8x128xf32>
    %cst_23 = arith.constant 1.000000e+00 : f32
    %42 = vector.broadcast %cst_23 : f32 to vector<8x128xf32>
    %43 = arith.addf %42, %41 : vector<8x128xf32>
    %cst_24 = arith.constant 5.000000e-01 : f32
    %44 = vector.broadcast %cst_24 : f32 to vector<8x128xf32>
    %45 = arith.mulf %44, %43 : vector<8x128xf32>
    %46 = arith.mulf %33, %45 : vector<8x128xf32>
    %47 = arith.addf %46, %25 : vector<8x128xf32>
    %48 = arith.truncf %47 : vector<8x128xf32> to vector<8x128xbf16>
    %c0_25 = arith.constant 0 : index
    %c0_26 = arith.constant 0 : index
    %49 = vector.load %arg9[%c0_25, %c0_26] : memref<8x128xbf16, #tpu.memory_space<vmem>>, vector<8x128xbf16>
    tpu.vector_store %arg9[%c0_25, %c0_26], %48 {strides = array<i32>} : memref<8x128xbf16, #tpu.memory_space<vmem>>, vector<8x128xbf16>,
    return
  }
  func.func @transform_0(%arg0: i32) -> (i32, i32) {
    %c0_i32 = arith.constant 0 : i32
    %c0_i32_0 = arith.constant 0 : i32
    return %arg0, %c0_i32 : i32, i32
  }
  func.func @transform_1(%arg0: i32) -> (i32, i32) {
    %c0_i32 = arith.constant 0 : i32
    %c0_i32_0 = arith.constant 0 : i32
    %c0_i32_1 = arith.constant 0 : i32
    return %c0_i32, %c0_i32_0 : i32, i32
  }
  func.func @transform_2(%arg0: i32) -> (i32, i32) {
    %c0_i32 = arith.constant 0 : i32
    %c0_i32_0 = arith.constant 0 : i32
    %c0_i32_1 = arith.constant 0 : i32
    return %c0_i32, %c0_i32_0 : i32, i32
  }
  func.func @transform_3(%arg0: i32) -> (i32, i32) {
    %c0_i32 = arith.constant 0 : i32
    %c0_i32_0 = arith.constant 0 : i32
    %c0_i32_1 = arith.constant 0 : i32
    return %c0_i32, %c0_i32_0 : i32, i32
  }
  func.func @transform_4(%arg0: i32) -> (i32, i32) {
    %c0_i32 = arith.constant 0 : i32
    %c0_i32_0 = arith.constant 0 : i32
    %c0_i32_1 = arith.constant 0 : i32
    return %c0_i32, %c0_i32_0 : i32, i32
  }
  func.func @transform_5(%arg0: i32) -> (i32, i32) {
    %c0_i32 = arith.constant 0 : i32
    %c0_i32_0 = arith.constant 0 : i32
    %c0_i32_1 = arith.constant 0 : i32
    return %c0_i32, %c0_i32_0 : i32, i32
  }
  func.func @transform_6(%arg0: i32) -> (i32, i32) {
    %c0_i32 = arith.constant 0 : i32
    %c0_i32_0 = arith.constant 0 : i32
    %c0_i32_1 = arith.constant 0 : i32
    return %c0_i32, %c0_i32_0 : i32, i32
  }
  func.func @transform_7(%arg0: i32) -> (i32, i32) {
    %c0_i32 = arith.constant 0 : i32
    %c0_i32_0 = arith.constant 0 : i32
    return %arg0, %c0_i32 : i32, i32
  }
  func.func @transform_8(%arg0: i32) -> (i32, i32) {
    %c0_i32 = arith.constant 0 : i32
    %c0_i32_0 = arith.constant 0 : i32
    return %arg0, %c0_i32 : i32, i32
  }
}

</mosaic_0001>

<bundles_post_ra>
// kernel: tpu_custom_call.1
= control target key start
LH: loop header
LB: loop body
LE: loop exit
PB: predicated region body
PF: predicated region fallthrough
CT: control target
= control target key end

     0   :  { %s1967_s0 = inlined_call_operand.hbm [shape: bf16[16,512], index: 0, kind: input, shape index: {}]   ;;  %s1968_s1 = inlined_call_operand.hbm [shape: bf16[512,128], index: 1, kind: input, shape index: {}]   ;;  %s1969_s2 = inlined_call_operand.vmem [shape: f32[1,128], index: 2, kind: input, shape index: {}]   ;;  %s1970_s3 = inlined_call_operand.hbm [shape: bf16[128,128], index: 3, kind: input, shape index: {}]   ;;  %s1971_s4 = inlined_call_operand.hbm [shape: bf16[128,128], index: 4, kind: input, shape index: {}]   ;;  %s1972_s5 = inlined_call_operand.vmem [shape: f32[1,128], index: 5, kind: input, shape index: {}]   ;;  %s1973_s6 = inlined_call_operand.vmem [shape: f32[1,128], index: 6, kind: input, shape index: {}]   ;;  %s1974_s7 = inlined_call_operand.hbm [shape: bf16[16,128], index: 7, kind: output, shape index: {0}]   ;;  %s1975_s8 = inlined_call_operand.hbm [shape: bf16[16,128], index: 8, kind: output, shape index: {1}]  }
   0x1   :  { %1980 = sst [smem:[#allocation18_spill]] %s1968_s1 }
   0x2   :  { %1981 = sst [smem:[#allocation19_spill]] %s1970_s3 }
   0x3   :  { %1982 = sst [smem:[#allocation20_spill]] %s1971_s4 }
   0x4   :  { %14 = vsyncpa [#allocation3], 0 }
   0x5   :  { %16 = vsyncpa [#allocation3 + $0x1], 0 }
   0x6   :  { %17 = vsyncpa [#allocation6], 0 }
   0x7   :  { %18 = vsyncpa [#allocation9], 0 }
   0x8   :  { %19 = vsyncpa [#allocation4], 0 }
   0x9   :  { %21 = vsyncpa [#allocation4 + $0x1], 0 }
   0xa   :  { %22 = vsyncpa [#allocation12], 0 }
   0xb   :  { %24 = vsyncpa [#allocation12 + $0x1], 0  ;;  %s1734_s27 = smov 0   ;;  %s1736_s28 = smov 0  }
   0xc   :  { %s1738_s29 = smov 0   ;;  %s1740_s30 = smov 0  }
   0xd LB: > { %s1755_s9 = sadd.s32 4294967295, %s1677_s30   ;;  %s1147_s10 = sadd.s32 4294967294, %s1677_s30   ;;  %s1677_s30 = sphi %s1740_s30, %s2005_s30   ;;  %s1673_s29 = sphi %s1738_s29, %s2004_s29   ;;  %s1669_s28 = sphi %s1736_s28, %s2003_s28   ;;  %s1665_s27 = sphi %s1734_s27, %s2002_s27  }
   0xe   : > { %p50_p0 = scmp.ne.s32.totalorder %s1669_s28, %s1665_s27  ;;  %p1976_p1 = scmp.eq.s32.totalorder %s1755_s9, 0 }
   0xf   : > { %p206_p3 = scmp.eq.s32.totalorder %s1147_s10, 1  ;;  %p1148_p5 = scmp.ge.s32.totalorder %s1677_s30, 1 }
  0x10   : > { %p1764_p4 = por %p1976_p1, %p50_p0  ;;  %p239_p7 = scmp.lt.s32.totalorder %s1677_s30, 3 }
  0x11   : > { %p1769_p6 = por %p206_p3, %p50_p0  ;;  %s1679_s14 = smov [#allocation5]  }
  0x12   : > { %s1983_s11 = scalar_select %p1764_p4, 1, 0 }
  0x13   : > { %s1984_s12 = scalar_select %p1769_p6, 1, 0 }
  0x14   : > { %p1774_p8 = pnand %p1148_p5, %p239_p7  ;;  %s251_s15 = sshll.u32 %s1679_s14, 4  ;;  %s252_s15 = int_to_ptr.vmem [resolvable:$true] %s251_s15 }
  0x15   : > { %s1680_s17 = smov [#allocation7]   ;;  %s1681_s19 = smov [#allocation8]  }
  0x16   : > { %s1985_s13 = scalar_select %p1774_p8, 1, 0 }
  0x17   : > { %p1345_p9 = pneg %p1774_p8  ;;  %s267_s18 = sshll.u32 %s1680_s17, 4  ;;  %s268_s18 = int_to_ptr.vmem [resolvable:$true] %s267_s18 }
  0x18   : > { %s280_s20 = sshll.u32 %s1681_s19, 4  ;;  %s1480_s21 = scalar_lea.vmem %s252_s15, 4096  ;;  %s281_s20 = int_to_ptr.vmem [resolvable:$true] %s280_s20 }
  0x19   : > { %p1783_p11 = pnand %p1345_p9, %p1976_p1  ;;  %p1481_p13 = scmp.ne.s32.totalorder %s252_s15, %s1480_s21 }
  0x1a   : > { %p1488_p5 = scmp.lt.s32.totalorder %s252_s15, %s252_s15  ;;  %p1489_p7 = scmp.lt.s32.totalorder %s1480_s21, %s1480_s21 }
  0x1b   : > { %p1471_p12 = pneg %p1783_p11 }
  0x1c   : > { %p1490_p9 = por %p1489_p7, %p1488_p5 }
  0x1d   : > { %p1483_p0 = pnand %p1481_p13, %p1471_p12 }
  0x1f   : > { %p1484_p3 = pneg %p1483_p0 }
  0x21   : > { %p1491_p10 = pnand %p1490_p9, %p1484_p3 }
  0x23   : > { %1494 = shalt.err (!%p1491_p10)
}
  0x24   : > { %s1682_s22 = smov 64   ;;  %s1683_s23 = smov 4  }
  0x25   : > { %s1987_s1 = sld [smem:[#allocation18_spill]]  ;;  %s1506_s26 = scalar_lea.vmem %s268_s18, 1024 }
  0x26   : > { %p1507_p1 = scmp.ne.s32.totalorder %s268_s18, %s1506_s26  ;;  %p1514_p2 = scmp.lt.s32.totalorder %s268_s18, %s268_s18 }
  0x27   : > { %p1515_p6 = scmp.lt.s32.totalorder %s1506_s26, %s1506_s26 }
  0x28   : > { %p1509_p13 = pnand %p1507_p1, %p1471_p12 }
  0x29   : > { %p1516_p5 = por %p1515_p6, %p1514_p2 }
  0x2a   : > { %p1510_p0 = pneg %p1509_p13 }
  0x2b   : > { %1348 = dma.hbm_to_vmem [thread:$0]  (!%p1783_p11), %s1987_s1, 4096, %s252_s15, [#allocation6], %s1682_s22, %s1682_s22, %s1683_s23  }
  0x2c   : > { %p1517_p3 = pnand %p1516_p5, %p1510_p0 }
  0x2e   : > { %1520 = shalt.err (!%p1517_p3)
}
  0x2f   : > { %s1988_s3 = sld [smem:[#allocation19_spill]]  ;;  %s1532_s15 = scalar_lea.vmem %s281_s20, 1024 }
  0x30   : > { %p1533_p10 = scmp.ne.s32.totalorder %s281_s20, %s1532_s15  ;;  %p1540_p9 = scmp.lt.s32.totalorder %s281_s20, %s281_s20 }
  0x31   : > { %p1541_p13 = scmp.lt.s32.totalorder %s1532_s15, %s1532_s15 }
  0x32   : > { %p1535_p7 = pnand %p1533_p10, %p1471_p12 }
  0x33   : > { %p1542_p4 = por %p1541_p13, %p1540_p9 }
  0x34   : > { %p1536_p1 = pneg %p1535_p7 }
  0x35   : > { %1351 = dma.hbm_to_vmem [thread:$0]  (!%p1783_p11), %s1988_s3, 1024, %s268_s18, [#allocation6], %s1682_s22, %s1682_s22, %s1683_s23  }
  0x36   : > { %p1543_p2 = pnand %p1542_p4, %p1536_p1 }
  0x38   : > { %1546 = shalt.err (!%p1543_p2)
}
  0x39   : > { %s1989_s4 = sld [smem:[#allocation20_spill]]  ;;  %s1814_s18 = sadd.s32 1, %s1677_s30  }
  0x3a   : > { %s34_s21 = ssub.s32 %s1677_s30, %s1814_s18  ;;  %s37_s16 = sadd.s32 1, %s1673_s29 }
  0x3b   : > { %p35_p4 = scmp.eq.s32.totalorder %s34_s21, 0  ;;  %p44_p6 = scmp.ne.s32.totalorder %s1673_s29, %s1669_s28 }
  0x3c   : > { %p45_p12 = scmp.eq.s32.totalorder %s1677_s30, 0  ;;  %p1369_p0 = scmp.lt.s32.totalorder %s1677_s30, 2 }
  0x3d   : > { %s1824_s24 = scalar_select %p35_p4, %s1673_s29, %s37_s16  }
  0x3e   : > { %p46_p5 = por %p45_p12, %p44_p6  ;;  %p1990_p3 = scmp.eq.s32.totalorder %s1755_s9, 1 }
  0x3f   : > { %1354 = dma.hbm_to_vmem [thread:$0]  (!%p1783_p11), %s1989_s4, 1024, %s281_s20, [#allocation9], %s1682_s22, %s1682_s22, %s1683_s23  }
  0x40   : > { %p1828_p10 = por %p1990_p3, %p44_p6  ;;  %s300_s26 = sand.u32 1, %s1673_s29  }
  0x41   : > { %s1224_s10 = sshll.u32 %s1677_s30, 8  ;;  %s1153_s20 = sshll.u32 %s300_s26, 4 }
  0x42   : > { %s1991_s25 = scalar_select %p1828_p10, 1, 0 }
  0x43   : > { %s1837_s14 = scalar_lea.hbm %s1967_s0, %s1224_s10  ;;  %s304_s15 = scalar_lea.vmem [#allocation2], %s1153_s20 }
  0x44   : > { %s312_s17 = sshll.u32 %s304_s15, 4  ;;  %p1839_p11 = pnand %p1369_p0, %p46_p5  ;;  %s313_s17 = int_to_ptr.vmem [resolvable:$true] %s312_s17 }
  0x45   : > { %s301_s21 = scalar_lea.sflag [#allocation3], %s300_s26  ;;  %s1547_s16 = scalar_lea.hbm %s1837_s14, 256 }
  0x46   : > { %p1548_p7 = scmp.ne.s32.totalorder %s1837_s14, %s1547_s16  ;;  %p1549_p1 = pneg %p1839_p11 }
  0x47   : > { %s1552_s23 = scalar_lea.hbm %s1967_s0, 512  ;;  %p1553_p2 = scmp.lt.s32.totalorder %s1837_s14, %s1967_s0 }
  0x48   : > { %p1550_p9 = pnand %p1549_p1, %p1548_p7  ;;  %p1554_p4 = scmp.lt.s32.totalorder %s1552_s23, %s1547_s16 }
  0x4a   : > { %p1551_p13 = pneg %p1550_p9  ;;  %p1555_p6 = por %p1554_p4, %p1553_p2 }
  0x4c   : > { %p1556_p12 = pnand %p1555_p6, %p1551_p13 }
  0x4e   : > { %1559 = shalt.err (!%p1556_p12)
}
  0x4f   : > { %s1560_s15 = scalar_lea.vmem %s313_s17, 256  ;;  %s1684_s26 = smov [#allocation2]  }
  0x50   : > { %p1561_p0 = scmp.ne.s32.totalorder %s313_s17, %s1560_s15  ;;  %s1565_s3 = sshll.u32 %s1684_s26, 4  ;;  %s1566_s3 = int_to_ptr.vmem [resolvable:$false] %s1565_s3 }
  0x51   : > { %s1567_s4 = scalar_lea.vmem %s1566_s3, 512  ;;  %p1568_p7 = scmp.lt.s32.totalorder %s313_s17, %s1566_s3 }
  0x52   : > { %p1563_p5 = pnand %p1561_p0, %p1549_p1  ;;  %p1569_p9 = scmp.lt.s32.totalorder %s1567_s4, %s1560_s15 }
  0x54   : > { %p1564_p3 = pneg %p1563_p5  ;;  %p1570_p10 = por %p1569_p9, %p1568_p7 }
  0x56   : > { %p1571_p8 = pnand %p1570_p10, %p1564_p3 }
  0x58   : > { %1574 = shalt.err (!%p1571_p8)
}
  0x59   : > { %1358 = dma.hbm_to_vmem [thread:$0]  (!%p1839_p11), %s1837_s14, 256, %s313_s17, %s301_s21  }
  0x5a   : > { %p1993_p13 = scmp.ne.s32.totalorder %s1985_s13, 0 }
  0x5b   : > { %s1860_s1 = sand.u32 (!%p1993_p13), 1, %s1669_s28   ;;  %p1994_p1 = scmp.ne.s32.totalorder (!%p1993_p13), %s1983_s11, 0 }
  0x5c   : > { %321 = sbr.rel (%p1993_p13) target bundleno = 812 (0x32c), region = 48  ;;  %s1157_s16 = sshll.u32 (!%p1993_p13), %s1860_s1, 4 }
  0x5d   : > { %s324_s10 = scalar_lea.sflag (!%p1993_p13), [#allocation3], %s1860_s1  ;;  %s1864_s3 = scalar_lea.vmem (!%p1993_p13), [#allocation2], %s1157_s16 }
  0x61   : > { %1644 = dma.done.wait (%p1994_p1), %s324_s10, 256  }
  0x62   : > { %1646 = vsyncadd (%p1994_p1), %s324_s10, 4294967040  ;;  %p1995_p8 = scmp.eq.s32.totalorder %s1755_s9, 0 }
  0x64   : > { %1648 = dma.done.wait (%p1995_p8), [#allocation6], 5120   ;;  %p1996_p10 = pmov %p1995_p8 }
  0x65   : > { %p1997_p11 = pmov %p1995_p8 }
  0x66   : > { %1650 = vsyncadd (%p1996_p10), [#allocation6], 4294962176 }
  0x67   : > { %1652 = dma.done.wait (%p1997_p11), [#allocation9], 1024   ;;  %p1998_p2 = pmov %p1995_p8 }
  0x68   : > { %v1413_v0 = vld [vmem:[#allocation5 + $0x78] sm:$0xff]   ;;  %v1417_v4 = vld [vmem:[#allocation5 + $0x70] sm:$0xff]   ;;  %v1421_v8 = vld [vmem:[#allocation5 + $0x68] sm:$0xff]   ;;  %v1685_v39 = vmov 0.0   ;;  %vm1686_vm0 = vmmov 0   ;;  %s1161_s17 = sshll.u32 %s1860_s1, 2 }
  0x69   : > { %1654 = vsyncadd (%p1998_p2), [#allocation9], 4294966272  ;;  %v1414_v1 = vld [vmem:[#allocation5 + $0xf8] sm:$0xff]   ;;  %1225 = vmatprep.subr.bf16.mxu0 %v1413_v0  ;;  %v1418_v5 = vld [vmem:[#allocation5 + $0xf0] sm:$0xff]   ;;  %s369_s19 = scalar_lea.vmem [#allocation10], %s1161_s17  ;;  %s1220_s21 = sshll.u32 %s1755_s9, 6 }
  0x6a   : > { %v1415_v2 = vld [vmem:[#allocation5 + $0x38] sm:$0xff]   ;;  %1247 = vmatprep.subr.bf16.mxu1 %v1414_v1  ;;  %v1419_v6 = vld [vmem:[#allocation5 + $0x30] sm:$0xff]   ;;  %v1422_v9 = vld [vmem:[#allocation5 + $0xe8] sm:$0xff]   ;;  %s1001_s20 = scalar_lea.hbm %s1974_s7, %s1220_s21  ;;  %s1003_s15 = sshll.u32 %s369_s19, 4  ;;  %s1004_s15 = int_to_ptr.vmem [resolvable:$true] %s1003_s15 }
  0x6b   : > { %v1416_v3 = vld [vmem:[#allocation5 + $0xb8] sm:$0xff]   ;;  %1226 = vmatpush3.bf16.msra.mxu0 %v1415_v2  ;;  %v1420_v7 = vld [vmem:[#allocation5 + $0xb0] sm:$0xff]   ;;  %v1423_v10 = vld [vmem:[#allocation5 + $0x28] sm:$0xff]   ;;  %s985_s26 = scalar_lea.sflag [#allocation4], %s1860_s1  ;;  %s1575_s16 = scalar_lea.vmem %s1004_s15, 64 }
  0x6c   : > { %1248 = vmatpush3.bf16.msra.mxu1 %v1416_v3  ;;  %1227 = vmatprep.subr.bf16.mxu0 %v1417_v4  ;;  %v1424_v11 = vld [vmem:[#allocation5 + $0xa8] sm:$0xff]   ;;  %v1425_v12 = vld [vmem:[#allocation5 + $0x60] sm:$0xff]   ;;  %v1429_v16 = vld [vmem:[#allocation5 + $0x58] sm:$0xff]   ;;  %p1576_p4 = scmp.ne.s32.totalorder %s1004_s15, %s1575_s16  ;;  %p1999_p6 = scmp.ne.s32.totalorder %s1991_s25, 0 }
  0x6d   : > { %1249 = vmatprep.subr.bf16.mxu1 %v1418_v5  ;;  %v1426_v13 = vld [vmem:[#allocation5 + $0xe0] sm:$0xff]   ;;  %v1430_v17 = vld [vmem:[#allocation5 + $0xd8] sm:$0xff]   ;;  %v1433_v20 = vld [vmem:[#allocation5 + $0x50] sm:$0xff]   ;;  %s1687_s10 = smov [#allocation10]  }
  0x6e   : > { %v1427_v14 = vld [vmem:[#allocation5 + $0x20] sm:$0xff]   ;;  %v1431_v18 = vld [vmem:[#allocation5 + $0x18] sm:$0xff]   ;;  %v1434_v21 = vld [vmem:[#allocation5 + $0xd0] sm:$0xff]   ;;  %p1577_p12 = pnand %p1576_p4, %p1999_p6 }
  0x6f   : > { %1228 = vmatpush3.bf16.msra.mxu0 %v1419_v6  ;;  %v1428_v15 = vld [vmem:[#allocation5 + $0xa0] sm:$0xff]   ;;  %v1432_v19 = vld [vmem:[#allocation5 + $0x98] sm:$0xff]   ;;  %v1435_v22 = vld [vmem:[#allocation5 + $0x10] sm:$0xff]  }
  0x70   : > { %1250 = vmatpush3.bf16.msra.mxu1 %v1420_v7  ;;  %1229 = vmatprep.subr.bf16.mxu0 %v1421_v8  ;;  %v1436_v23 = vld [vmem:[#allocation5 + $0x90] sm:$0xff]   ;;  %v1437_v24 = vld [vmem:[#allocation5 + $0x48] sm:$0xff]   ;;  %v1441_v28 = vld [vmem:[#allocation5 + $0x40] sm:$0xff]   ;;  %p1578_p0 = pneg %p1577_p12 }
  0x71   : > { %1251 = vmatprep.subr.bf16.mxu1 %v1422_v9  ;;  %v1438_v25 = vld [vmem:[#allocation5 + $0xc8] sm:$0xff]   ;;  %v1442_v29 = vld [vmem:[#allocation5 + $0xc0] sm:$0xff]   ;;  %v1449_v38 = vld [vmem:[#allocation7 + $0x38] sm:$0xff]  }
  0x72   : > { %v1439_v26 = vld [vmem:[#allocation5 + $0x8] sm:$0xff]   ;;  %v1443_v30 = vld [vmem:[#allocation5] sm:$0xff]   ;;  %v1450_v40 = vld [vmem:[#allocation7 + $0x30] sm:$0xff]  }
  0x73   : > { %1230 = vmatpush3.bf16.msra.mxu0 %v1423_v10  ;;  %v1440_v27 = vld [vmem:[#allocation5 + $0x88] sm:$0xff]   ;;  %v1444_v31 = vld [vmem:[#allocation5 + $0x80] sm:$0xff]   ;;  %v1453_v43 = vld [vmem:[#allocation7 + $0x18] sm:$0xff]  }
  0x74   : > { %1252 = vmatpush3.bf16.msra.mxu1 %v1424_v11  ;;  %1231 = vmatprep.subr.bf16.mxu0 %v1425_v12  ;;  %v378_v32 = vld [vmem:[%s1864_s3] sm:$0xff]  ;;  %v379_v33 = vld [vmem:[%s1864_s3 + $0x8] sm:$0xff]  ;;  %s1579_s3 = sshll.u32 %s1687_s10, 4  ;;  %s1580_s3 = int_to_ptr.vmem [resolvable:$false] %s1579_s3 }
  0x75   : > { %1253 = vmatprep.subr.bf16.mxu1 %v1426_v13  ;;  %v1164_v34 = vcombine.low %v378_v32, %v378_v32  ;;  %v1165_v35 = vcombine.high %v378_v32, %v378_v32  ;;  %v1166_v36 = vcombine.low %v379_v33, %v379_v33  ;;  %v1167_v37 = vcombine.high %v379_v33, %v379_v33  ;;  %v1451_v41 = vld [vmem:[#allocation7 + $0x28] sm:$0xff]   ;;  %v1452_v42 = vld [vmem:[#allocation7 + $0x20] sm:$0xff]   ;;  %v1454_v44 = vld [vmem:[#allocation7 + $0x10] sm:$0xff]   ;;  %s1581_s4 = scalar_lea.vmem %s1580_s3, 128  ;;  %p1582_p5 = scmp.lt.s32.totalorder %s1004_s15, %s1580_s3 }
  0x76   : > { %v1455_v45 = vld [vmem:[#allocation7 + $0x8] sm:$0xff]   ;;  %v1456_v46 = vld [vmem:[#allocation7] sm:$0xff]   ;;  %v1457_v61 = vld [vmem:[#allocation8 + $0x38] sm:$0xff]   ;;  %p1583_p3 = scmp.lt.s32.totalorder %s1581_s4, %s1575_s16 }
  0x77   : > { %1232 = vmatpush3.bf16.msra.mxu0 %v1427_v14  ;;  %689 = vmatprep.mubr.bf16.mxu0 %v1165_v35  ;;  %v1163_v49 = vld [vmem:[%s1969_s2] ss:$0 sm:$0xff]  ;;  %v1458_v62 = vld [vmem:[#allocation8 + $0x30] sm:$0xff]   ;;  %v1459_v63 = vld [vmem:[#allocation8 + $0x28] sm:$0xff]  }
  0x78   : > { %1254 = vmatpush3.bf16.msra.mxu1 %v1428_v15  ;;  %1233 = vmatprep.subr.bf16.mxu0 %v1429_v16  ;;  %v1460_v0 = vld [vmem:[#allocation8 + $0x20] sm:$0xff]   ;;  %v1461_v1 = vld [vmem:[#allocation8 + $0x18] sm:$0xff]   ;;  %v1462_v2 = vld [vmem:[#allocation8 + $0x10] sm:$0xff]   ;;  %p1584_p7 = por %p1583_p3, %p1582_p5 }
  0x79   : > { %1255 = vmatprep.subr.bf16.mxu1 %v1430_v17  ;;  %729 = vmatprep.mubr.bf16.mxu1 %v1167_v37  ;;  %v1463_v3 = vld [vmem:[#allocation8 + $0x8] sm:$0xff]   ;;  %v1464_v4 = vld [vmem:[#allocation8] sm:$0xff]  }
  0x7a   : > { %v1200_v5 = vld [vmem:[%s1972_s5] ss:$0 sm:$0xff]  ;;  %p1585_p9 = pnand %p1584_p7, %p1578_p0 }
  0x7b   : > { %1234 = vmatpush3.bf16.msra.mxu0 %v1431_v18 }
  0x7c   : > { %1256 = vmatpush3.bf16.msra.mxu1 %v1432_v19  ;;  %1235 = vmatprep.subr.bf16.mxu0 %v1433_v20 }
  0x7d   : > { %1257 = vmatprep.subr.bf16.mxu1 %v1434_v21 }
  0x7f   : > { %1236 = vmatpush3.bf16.msra.mxu0 %v1435_v22 }
  0x80   : > { %1258 = vmatpush3.bf16.msra.mxu1 %v1436_v23  ;;  %1237 = vmatprep.subr.bf16.mxu0 %v1437_v24 }
  0x81   : > { %1259 = vmatprep.subr.bf16.mxu1 %v1438_v25 }
  0x83   : > { %1238 = vmatpush3.bf16.msra.mxu0 %v1439_v26 }
  0x84   : > { %1260 = vmatpush3.bf16.msra.mxu1 %v1440_v27  ;;  %1239 = vmatprep.subr.bf16.mxu0 %v1441_v28 }
  0x85   : > { %1261 = vmatprep.subr.bf16.mxu1 %v1442_v29 }
  0x87   : > { %1240 = vmatpush3.bf16.msra.mxu0 %v1443_v30 }
  0x88   : > { %1262 = vmatpush3.bf16.msra.mxu1 %v1444_v31  ;;  %1287 = vmatprep.subr.bf16.mxu0 %v1685_v39 }
  0x89   : > { %1307 = vmatprep.subr.bf16.mxu1 %v1685_v39 }
  0x8a   : > { %690 = vmatmul.mubr.bf16.vlgmr.msra.gmra.mxu0 %v1164_v34 }
  0x8b   : > { %730 = vmatmul.mubr.bf16.vlgmr.msra.gmra.mxu1 %v1166_v36  ;;  %1288 = vmatpush3.bf16.msra.mxu0 %v1449_v38 }
  0x8c   : > { %1289 = vmatprep.subr.bf16.mxu0 %v1685_v39  ;;  %1303 = vmatprep.mubr.msk.bf16.mxu0 %vm1686_vm0, %v1685_v39 }
  0x8d   : > { %1323 = vmatprep.mubr.msk.bf16.mxu1 %vm1686_vm0, %v1685_v39  ;;  %1308 = vmatpush3.bf16.msra.mxu1 %v1457_v61 }
  0x8e   : > { %1309 = vmatprep.subr.bf16.mxu1 %v1685_v39 }
  0x8f   : > { %1290 = vmatpush3.bf16.msra.mxu0 %v1450_v40 }
  0x90   : > { %1291 = vmatprep.subr.bf16.mxu0 %v1685_v39 }
  0x91   : > { %1310 = vmatpush3.bf16.msra.mxu1 %v1458_v62 }
  0x92   : > { %1311 = vmatprep.subr.bf16.mxu1 %v1685_v39 }
  0x93   : > { %1292 = vmatpush3.bf16.msra.mxu0 %v1451_v41 }
  0x94   : > { %1293 = vmatprep.subr.bf16.mxu0 %v1685_v39 }
  0x95   : > { %1312 = vmatpush3.bf16.msra.mxu1 %v1459_v63 }
  0x96   : > { %1313 = vmatprep.subr.bf16.mxu1 %v1685_v39 }
  0x97   : > { %1294 = vmatpush3.bf16.msra.mxu0 %v1452_v42 }
  0x98   : > { %1295 = vmatprep.subr.bf16.mxu0 %v1685_v39 }
  0x99   : > { %1314 = vmatpush3.bf16.msra.mxu1 %v1460_v0 }
  0x9a   : > { %1315 = vmatprep.subr.bf16.mxu1 %v1685_v39 }
  0x9b   : > { %1296 = vmatpush3.bf16.msra.mxu0 %v1453_v43 }
  0x9c   : > { %1297 = vmatprep.subr.bf16.mxu0 %v1685_v39 }
  0x9d   : > { %1316 = vmatpush3.bf16.msra.mxu1 %v1461_v1 }
  0x9e   : > { %1317 = vmatprep.subr.bf16.mxu1 %v1685_v39 }
  0x9f   : > { %1298 = vmatpush3.bf16.msra.mxu0 %v1454_v44 }
  0xa0   : > { %1299 = vmatprep.subr.bf16.mxu0 %v1685_v39 }
  0xa1   : > { %1318 = vmatpush3.bf16.msra.mxu1 %v1462_v2 }
  0xa2   : > { %1319 = vmatprep.subr.bf16.mxu1 %v1685_v39 }
  0xa3   : > { %1300 = vmatpush3.bf16.msra.mxu0 %v1455_v45 }
  0xa4   : > { %1301 = vmatprep.subr.bf16.mxu0 %v1685_v39 }
  0xa5   : > { %1320 = vmatpush3.bf16.msra.mxu1 %v1463_v3 }
  0xa6   : > { %1321 = vmatprep.subr.bf16.mxu1 %v1685_v39 }
  0xa7   : > { %1302 = vmatpush3.bf16.msra.mxu0 %v1456_v46 }
  0xa9   : > { %1322 = vmatpush3.bf16.msra.mxu1 %v1464_v4 }
 0x14a   : > { %v1241_v47 = vpop.f32.mrf.mxu0 }
 0x14b   : > { %v1263_v48 = vpop.f32.mrf.mxu1 }
 0x14c   : > { %v1242_v50 = vpop.f32.mrf.mxu0 }
 0x14d   : > { %v1264_v51 = vpop.f32.mrf.mxu1  ;;  %v1243_v52 = vadd.f32 %v1242_v50, %v1241_v47 }
 0x14e   : > { %v1244_v53 = vpop.f32.mrf.mxu0  ;;  %v1265_v56 = vadd.f32 %v1264_v51, %v1263_v48 }
 0x14f   : > { %v1266_v54 = vpop.f32.mrf.mxu1  ;;  %v692_v55 = vadd.f32 %v1243_v52, %v1163_v49 }
 0x150   : > { %v1245_v57 = vpop.f32.mrf.mxu0 }
 0x151   : > { %v1267_v58 = vpop.f32.mrf.mxu1  ;;  %v732_v59 = vadd.f32 %v1265_v56, %v692_v55 }
 0x153   : > { %v737_v60 = vpack.c.bf16 %v732_v59, %v732_v59 }
 0x155   : > { %1304 = vmatmul.mubr.bf16.vlgmr.msra.gmra.mxu0 %v737_v60 }
 0x215   : > { %v843_v6 = vpop.f32.mrf.mxu0 }
 0x216   : > { %v844_v7 = vadd.f32 %v1200_v5, %v843_v6 }
 0x217   : > { %v1305_v8 = vpop.f32.mrf.mxu0 }
 0x218   : > { %v849_v9 = vmul.f32 %v844_v7, %v844_v7 }
 0x219   : > { %v846_v10 = vpop.f32.mrf.mxu0 }
 0x21a   : > { %v850_v11 = vmul.f32 %v849_v9, %v844_v7 }
 0x21b   : > { %v1306_v12 = vpop.f32.mrf.mxu0 }
 0x21c   : > { %v851_v13 = vmul.f32 0.044715, %v850_v11 }
 0x21e   : > { %v852_v14 = vadd.f32 %v851_v13, %v844_v7 }
 0x220   : > { %v853_v15 = vmul.f32 0.7978846, %v852_v14 }
 0x222   : > { %1465 = vtanh.f32 %v853_v15 }
 0x22f   : > { %v1466_v16 = vpop.eup %1465 }
 0x230   : > { %v855_v17 = vadd.f32 1.0, %v1466_v16 }
 0x232   : > { %v856_v18 = vmul.f32 0.5, %v855_v17 }
 0x234   : > { %v857_v19 = vmul.f32 %v856_v18, %v844_v7 }
 0x236   : > { %v858_v20 = vadd.f32 %v857_v19, %v732_v59 }
 0x238   : > { %v859_v21 = vpack.c.bf16 %v858_v20, %v858_v20 }
 0x23a   : > { %1324 = vmatmul.mubr.bf16.vlgmr.msra.gmra.mxu1 %v859_v21  ;;  %860 = vst [vmem:[%s369_s19] sm:$0xf] %v859_v21 }
 0x23b   : > { %1588 = shalt.err (!%p1585_p9)
}
 0x23c   : > { %s1589_s11 = scalar_lea.hbm %s1001_s20, 64  ;;  %s1593_s19 = scalar_lea.hbm %s1974_s7, 128 }
 0x23d   : > { %p1590_p13 = scmp.ne.s32.totalorder %s1001_s20, %s1589_s11  ;;  %p1594_p10 = scmp.lt.s32.totalorder %s1001_s20, %s1974_s7 }
 0x23e   : > { %p1595_p11 = scmp.lt.s32.totalorder %s1593_s19, %s1589_s11 }
 0x23f   : > { %p1591_p1 = pnand %p1590_p13, %p1999_p6 }
 0x240   : > { %p1596_p2 = por %p1595_p11, %p1594_p10 }
 0x241   : > { %p1592_p8 = pneg %p1591_p1 }
 0x243   : > { %p1597_p4 = pnand %p1596_p2, %p1592_p8 }
 0x245   : > { %1600 = shalt.err (!%p1597_p4)
}
 0x246   : > { %1341 = dma.vmem_to_hbm [thread:$0]  (%p1999_p6), %s1004_s15, 64, %s1001_s20, %s985_s26   ;;  %v1209_v22 = vld [vmem:[%s1973_s6] ss:$0 sm:$0xff] }
 0x247   : > { %s376_s20 = scalar_lea.vmem [#allocation11], %s1161_s17  ;;  %s1014_s4 = scalar_lea.hbm %s1975_s8, %s1220_s21 }
 0x248   : > { %s1016_s15 = sshll.u32 %s376_s20, 4  ;;  %s990_s11 = scalar_lea.sflag [#allocation12], %s1860_s1  ;;  %s1017_s15 = int_to_ptr.vmem [resolvable:$true] %s1016_s15 }
 0x249   : > { %s1601_s13 = scalar_lea.vmem %s1017_s15, 64  ;;  %s1688_s14 = smov [#allocation11]  }
 0x24a   : > { %p1602_p12 = scmp.ne.s32.totalorder %s1017_s15, %s1601_s13  ;;  %s1605_s19 = sshll.u32 %s1688_s14, 4  ;;  %s1606_s19 = int_to_ptr.vmem [resolvable:$false] %s1605_s19 }
 0x24b   : > { %s1607_s17 = scalar_lea.vmem %s1606_s19, 128  ;;  %p1608_p3 = scmp.lt.s32.totalorder %s1017_s15, %s1606_s19 }
 0x24c   : > { %p1603_p0 = pnand %p1602_p12, %p1999_p6  ;;  %p1609_p7 = scmp.lt.s32.totalorder %s1607_s17, %s1601_s13 }
 0x24e   : > { %p1604_p5 = pneg %p1603_p0  ;;  %p1610_p9 = por %p1609_p7, %p1608_p3 }
 0x250   : > { %p1611_p13 = pnand %p1610_p9, %p1604_p5 }
 0x2fa   : > { %v966_v23 = vpop.f32.mrf.mxu1 }
 0x2fb   : > { %v967_v24 = vadd.f32 %v1209_v22, %v966_v23 }
 0x2fc   : > { %v1325_v25 = vpop.f32.mrf.mxu1 }
 0x2fd   : > { %v972_v26 = vmul.f32 %v967_v24, %v967_v24 }
 0x2fe   : > { %v969_v27 = vpop.f32.mrf.mxu1 }
 0x2ff   : > { %v973_v28 = vmul.f32 %v972_v26, %v967_v24 }
 0x300   : > { %v1326_v29 = vpop.f32.mrf.mxu1 }
 0x301   : > { %v974_v30 = vmul.f32 0.044715, %v973_v28 }
 0x303   : > { %v975_v31 = vadd.f32 %v974_v30, %v967_v24 }
 0x305   : > { %v976_v32 = vmul.f32 0.7978846, %v975_v31 }
 0x307   : > { %1467 = vtanh.f32 %v976_v32 }
 0x314   : > { %v1468_v33 = vpop.eup %1467 }
 0x315   : > { %v978_v34 = vadd.f32 1.0, %v1468_v33 }
 0x317   : > { %v979_v35 = vmul.f32 0.5, %v978_v34 }
 0x319   : > { %v980_v36 = vmul.f32 %v979_v35, %v967_v24 }
 0x31b   : > { %v981_v37 = vadd.f32 %v980_v36, %v858_v20 }
 0x31d   : > { %v982_v38 = vpack.c.bf16 %v981_v37, %v981_v37 }
 0x31f   : > { %983 = vst [vmem:[%s376_s20] sm:$0xf] %v982_v38 }
 0x320   : > { %1614 = shalt.err (!%p1611_p13)
}
 0x321   : > { %s1615_s9 = scalar_lea.hbm %s1014_s4, 64  ;;  %s1619_s22 = scalar_lea.hbm %s1975_s8, 128 }
 0x322   : > { %p1616_p1 = scmp.ne.s32.totalorder %s1014_s4, %s1615_s9  ;;  %p1620_p11 = scmp.lt.s32.totalorder %s1014_s4, %s1975_s8 }
 0x323   : > { %p1621_p2 = scmp.lt.s32.totalorder %s1619_s22, %s1615_s9 }
 0x324   : > { %p1617_p8 = pnand %p1616_p1, %p1999_p6 }
 0x325   : > { %p1622_p4 = por %p1621_p2, %p1620_p11 }
 0x326   : > { %p1618_p10 = pneg %p1617_p8 }
 0x328   : > { %p1623_p12 = pnand %p1622_p4, %p1618_p10 }
 0x32a   : > { %1626 = shalt.err (!%p1623_p12)
}
 0x32b   : > { %1342 = dma.vmem_to_hbm [thread:$0]  (%p1999_p6), %s1017_s15, 64, %s1014_s4, %s990_s11  }
 0x32c PF: > { %s1028_s10 = sand.u32 1, %s1665_s27   ;;  %p2000_p0 = scmp.ne.s32.totalorder %s1984_s12, 0 }
 0x32d   : > { %p2001_p5 = scmp.ge.s32.totalorder %s1677_s30, 2  ;;  %s1029_s20 = scalar_lea.sflag [#allocation4], %s1028_s10 }
 0x32f   : > { %p1360_p3 = pnand %p2001_p5, %p2000_p0 }
 0x331   : > { %p1361_p7 = pneg %p1360_p3 }
 0x333   : > { %1656 = dma.done.wait (%p1361_p7), %s1029_s20, 64  }
 0x334   : > { %1658 = vsyncadd (%p1361_p7), %s1029_s20, 4294967232  ;;  %s1038_s26 = scalar_lea.sflag [#allocation12], %s1028_s10 }
 0x335   : > { %1660 = dma.done.wait (%p1361_p7), %s1038_s26, 64  }
 0x336   : > { %1662 = vsyncadd (%p1361_p7), %s1038_s26, 4294967232  ;;  %p27_p6 = scmp.ge.s32.totalorder %s1814_s18, 4   ;;  %s2002_s27 = smov %s1669_s28 }
 0x337   : > { %s2003_s28 = smov %s1673_s29  ;;  %s2004_s29 = smov %s1824_s24 }
 0x338   : > { %s2005_s30 = smov %s1814_s18  ;;  %29 = sbr.rel (!%p27_p6) target bundleno = 13 (0xd), region = 122 }
 0x33d   :  { %1043 = vsyncpa [#allocation3], 1 }
 0x33e   :  { %1045 = vsyncpa [#allocation3 + $0x1], 1 }
 0x33f   :  { %1046 = vsyncpa [#allocation6], 1 }
 0x340   :  { %1047 = vsyncpa [#allocation9], 1 }
 0x341   :  { %1048 = vsyncpa [#allocation4], 1 }
 0x342   :  { %1050 = vsyncpa [#allocation4 + $0x1], 1 }
 0x343   :  { %1051 = vsyncpa [#allocation12], 1 }
 0x344   :  { %1053 = vsyncpa [#allocation12 + $0x1], 1 }

</bundles_post_ra>
